<compile_context>
chip_gen: v7x
topology: tpu7x:2x2x1
jax: 0.10.0
libtpu: 0.0.40
codegen_flags: <defaults>
</compile_context>

<pallas_src>
import functools

import jax
import jax.numpy as jnp
from jax import lax
from jax.experimental import pallas as pl
from jax.experimental.pallas import tpu as pltpu

DICE_WEIGHT = 0.7
BOUNDARY_WEIGHT = 0.3
DICE_SMOOTH = 1.0
BOUNDARY_THETA = 1.0  # unused by the reference forward pass (kept for parity)

# TODO(synk): class_weights path of CombinedLoss is not implemented (default
#             __init__ uses class_weights=None, which is what we reproduce).


def _combined_loss_kernel(logits_ref, targets_ref,
                          inter_ref, psum_ref, tsum_ref, mism_ref, *, W):
    """One grid step: Bt*C rows, each row is one flattened (H, W) channel image."""
    _, HW = logits_ref.shape

    lg = logits_ref[...]
    tg = targets_ref[...]
    probs = jax.nn.sigmoid(lg)                       # EUP

    # ------------------------------------------------ dice partials (per row)
    inter_ref[...] = jnp.sum(probs * tg, axis=1, keepdims=True)[None]
    psum_ref[...] = jnp.sum(probs, axis=1, keepdims=True)[None]
    tsum_ref[...] = jnp.sum(tg, axis=1, keepdims=True)[None]

    # ---------------------------------------- Sobel boundary maps (roll + VPU)
    # Flat pixel index p = h*W + w along the lane axis.  The 3x3 conv's zero
    # padding is reproduced by zeroing lanes whose shifted neighbour falls
    # outside the image (this also kills the roll wrap-around).
    p = lax.broadcasted_iota(jnp.int32, (1, HW), 1)
    if W & (W - 1) == 0:
        w_idx = p & (W - 1)                          # cheap power-of-two mod
    else:
        w_idx = p % W
    has_left = (w_idx != 0).astype(jnp.float32)      # p-1 exists (same image row)
    has_right = (w_idx != (W - 1)).astype(jnp.float32)
    has_up = (p >= W).astype(jnp.float32)            # p-W exists
    has_down = (p < (HW - W)).astype(jnp.float32)    # p+W exists

    def shifted(x, delta, valid):
        # x[p - delta] with zero padding; roll amount normalised to [0, HW).
        return pltpu.roll(x, delta % HW, axis=1) * valid

    def boundary(x):
        xl = shifted(x, 1, has_left)                 # x[h, w-1]
        xr = shifted(x, -1, has_right)               # x[h, w+1]
        d_w = xr - xl                                # horizontal difference
        s_w = xl + 2.0 * x + xr                      # horizontal smoothing
        g_x = shifted(d_w, W, has_up) + 2.0 * d_w + shifted(d_w, -W, has_down)
        g_y = shifted(s_w, -W, has_down) - shifted(s_w, W, has_up)
        return (g_x * g_x + g_y * g_y) > 0.25        # sqrt-free threshold

    mismatch = boundary(probs) != boundary(tg)
    # BCE with PyTorch's -100 log clamp on exact {0,1} maps == 100 * mismatch
    # rate; keep the count in int32 so it stays exact for large images.
    mism_ref[...] = jnp.sum(mismatch.astype(jnp.int32), axis=1, keepdims=True)[None]


def _vmem_limit_bytes():
    """Conservative per-kernel VMEM budget (v7x only has 64 MiB per TensorCore)."""
    cap = 64 * 1024 * 1024
    try:
        info = pltpu.get_tpu_info()
        cap = int(getattr(info, "vmem_capacity_bytes", cap))
    except Exception:
        pass
    return min(3 * cap // 4, 96 * 1024 * 1024)


def _pick_block_batch(B, C, HW, block_budget_bytes):
    """Largest divisor Bt of B whose (Bt*C, HW) f32 block fits the budget while
    keeping the row block tile-aligned (Bt*C % 8 == 0) unless it is the full array."""
    best = None
    for bt in range(1, B + 1):
        if B % bt:
            continue
        if bt != B and (bt * C) % 8 != 0:
            continue
        if bt * C * HW * 4 <= block_budget_bytes:
            best = bt
    if best is None:
        for bt in range(1, B + 1):
            if B % bt == 0 and (bt == B or (bt * C) % 8 == 0):
                best = bt
                break
    # TODO(synk): if even the smallest aligned block exceeds VMEM (huge C*H*W),
    #             the image itself would have to be tiled; not implemented.
    return best if best is not None else B


def combined_loss(logits, targets, *, block_batch=None):
    B, C, H, W = logits.shape
    HW = H * W
    n_rows = B * C
    n_elems = B * C * H * W

    vmem_limit = _vmem_limit_bytes()
    # 2 inputs x 2 pipeline buffers + ~10 live elementwise temporaries per step.
    block_budget = max(vmem_limit // 16, 128 * 1024)
    Bt = _pick_block_batch(B, C, HW, block_budget) if block_batch is None else block_batch
    nsteps = B // Bt
    BtC = Bt * C

    # Free, layout-preserving HBM reshape: one lane-dense row per (b, c) image.
    logits2 = logits.astype(jnp.float32).reshape(n_rows, HW)
    targets2 = targets.astype(jnp.float32).reshape(n_rows, HW)

    cost = pl.CostEstimate(
        flops=int(45 * n_elems),                     # elementwise Sobel + dice
        transcendentals=int(n_elems),                # sigmoid
        bytes_accessed=int(2 * n_elems * 4 + 4 * nsteps * BtC * 4),
    )

    kernel = functools.partial(_combined_loss_kernel, W=W)
    part_shape = (nsteps, BtC, 1)
    part_spec = pl.BlockSpec((1, BtC, 1), lambda i: (i, 0, 0))

    inter, psum, tsum, mism = pl.pallas_call(
        kernel,
        out_shape=(
            jax.ShapeDtypeStruct(part_shape, jnp.float32),
            jax.ShapeDtypeStruct(part_shape, jnp.float32),
            jax.ShapeDtypeStruct(part_shape, jnp.float32),
            jax.ShapeDtypeStruct(part_shape, jnp.int32),
        ),
        grid_spec=pltpu.PrefetchScalarGridSpec(
            num_scalar_prefetch=0,
            grid=(nsteps,),
            in_specs=[
                pl.BlockSpec((BtC, HW), lambda i: (i, 0)),
                pl.BlockSpec((BtC, HW), lambda i: (i, 0)),
            ],
            out_specs=(part_spec, part_spec, part_spec, part_spec),
        ),
        compiler_params=pltpu.CompilerParams(
            dimension_semantics=("parallel",),       # independent steps -> megacore
            vmem_limit_bytes=vmem_limit,
        ),
        cost_estimate=cost,
    )(logits2, targets2)

    # Tiny epilogue over B*C partials in plain XLA.
    inter_b = inter.reshape(B, C).sum(axis=1)
    p_b = psum.reshape(B, C).sum(axis=1)
    t_b = tsum.reshape(B, C).sum(axis=1)
    dice = (2.0 * inter_b + DICE_SMOOTH) / (p_b + t_b + DICE_SMOOTH)
    dice_loss = 1.0 - jnp.mean(dice)
    boundary_loss = 100.0 * jnp.sum(mism).astype(jnp.float32) / float(n_elems)
    return DICE_WEIGHT * dice_loss + BOUNDARY_WEIGHT * boundary_loss


if __name__ == "__main__":
    key = jax.random.PRNGKey(0)
    k1, k2 = jax.random.split(key)
    B, C, H, W = 2, 4, 16, 16
    logits = 2.0 * jax.random.normal(k1, (B, C, H, W), dtype=jnp.float32)
    targets = (jax.random.uniform(k2, (B, C, H, W)) > 0.5).astype(jnp.float32)

    loss = combined_loss(logits, targets)
    loss = jax.block_until_ready(loss)
    assert bool(jnp.isfinite(loss))
    print("KERNEL_OK")
</pallas_src>

<mosaic_0001>
module attributes {stable_mosaic.version = 11 : i64} {
  func.func @_combined_loss_kernel(%arg0: i32, %arg1: memref<8x256xf32, #tpu.memory_space<vmem>>, %arg2: memref<8x256xf32, #tpu.memory_space<vmem>>, %arg3: memref<1x8x1xf32, #tpu.memory_space<vmem>>, %arg4: memref<1x8x1xf32, #tpu.memory_space<vmem>>, %arg5: memref<1x8x1xf32, #tpu.memory_space<vmem>>, %arg6: memref<1x8x1xi32, #tpu.memory_space<vmem>>) attributes {dimension_semantics = [#tpu.dimension_semantics<parallel>], iteration_bounds = array<i64: 1>, scalar_prefetch = 0 : i64, scratch_operands = 0 : i64, tpu.core_type = #tpu.core_type<tc>, window_params = [{transform_indices = @transform_0, window_bounds = array<i64: 8, 256>}, {transform_indices = @transform_1, window_bounds = array<i64: 8, 256>}, {transform_indices = @transform_2, window_bounds = array<i64: 1, 8, 1>}, {transform_indices = @transform_3, window_bounds = array<i64: 1, 8, 1>}, {transform_indices = @transform_4, window_bounds = array<i64: 1, 8, 1>}, {transform_indices = @transform_5, window_bounds = array<i64: 1, 8, 1>}]} {
    %c0 = arith.constant 0 : index
    %c0_0 = arith.constant 0 : index
    %0 = vector.load %arg1[%c0, %c0_0] : memref<8x256xf32, #tpu.memory_space<vmem>>, vector<8x256xf32>
    %c0_1 = arith.constant 0 : index
    %c0_2 = arith.constant 0 : index
    %1 = vector.load %arg2[%c0_1, %c0_2] : memref<8x256xf32, #tpu.memory_space<vmem>>, vector<8x256xf32>
    %2 = arith.negf %0 : vector<8x256xf32>
    %3 = math.exp %2 : vector<8x256xf32>
    %cst = arith.constant 1.000000e+00 : f32
    %4 = vector.broadcast %cst : f32 to vector<8x256xf32>
    %5 = arith.addf %4, %3 : vector<8x256xf32>
    %6 = arith.divf %4, %5 : vector<8x256xf32>
    %7 = arith.mulf %6, %1 : vector<8x256xf32>
    %cst_3 = arith.constant dense<0.000000e+00> : vector<8xf32>
    %8 = vector.multi_reduction <add>, %7, %cst_3 [1] : vector<8x256xf32> to vector<8xf32>
    %9 = vector.shape_cast %8 : vector<8xf32> to vector<8x1xf32>
    %10 = vector.shape_cast %9 : vector<8x1xf32> to vector<1x8x1xf32>
    %c0_4 = arith.constant 0 : index
    %c0_5 = arith.constant 0 : index
    %c0_6 = arith.constant 0 : index
    %11 = vector.load %arg3[%c0_4, %c0_5, %c0_6] : memref<1x8x1xf32, #tpu.memory_space<vmem>>, vector<1x8x1xf32>
    tpu.vector_store %arg3[%c0_4, %c0_5, %c0_6], %10 {strides = array<i32>} : memref<1x8x1xf32, #tpu.memory_space<vmem>>, vector<1x8x1xf32>,
    %cst_7 = arith.constant dense<0.000000e+00> : vector<8xf32>
    %12 = vector.multi_reduction <add>, %6, %cst_7 [1] : vector<8x256xf32> to vector<8xf32>
    %13 = vector.shape_cast %12 : vector<8xf32> to vector<8x1xf32>
    %14 = vector.shape_cast %13 : vector<8x1xf32> to vector<1x8x1xf32>
    %c0_8 = arith.constant 0 : index
    %c0_9 = arith.constant 0 : index
    %c0_10 = arith.constant 0 : index
    %15 = vector.load %arg4[%c0_8, %c0_9, %c0_10] : memref<1x8x1xf32, #tpu.memory_space<vmem>>, vector<1x8x1xf32>
    tpu.vector_store %arg4[%c0_8, %c0_9, %c0_10], %14 {strides = array<i32>} : memref<1x8x1xf32, #tpu.memory_space<vmem>>, vector<1x8x1xf32>,
    %cst_11 = arith.constant dense<0.000000e+00> : vector<8xf32>
    %16 = vector.multi_reduction <add>, %1, %cst_11 [1] : vector<8x256xf32> to vector<8xf32>
    %17 = vector.shape_cast %16 : vector<8xf32> to vector<8x1xf32>
    %18 = vector.shape_cast %17 : vector<8x1xf32> to vector<1x8x1xf32>
    %c0_12 = arith.constant 0 : index
    %c0_13 = arith.constant 0 : index
    %c0_14 = arith.constant 0 : index
    %19 = vector.load %arg5[%c0_12, %c0_13, %c0_14] : memref<1x8x1xf32, #tpu.memory_space<vmem>>, vector<1x8x1xf32>
    tpu.vector_store %arg5[%c0_12, %c0_13, %c0_14], %18 {strides = array<i32>} : memref<1x8x1xf32, #tpu.memory_space<vmem>>, vector<1x8x1xf32>,
    %20 = tpu.iota {dimensions = array<i32: 1>} : vector<1x256xi32>
    %c15_i32 = arith.constant 15 : i32
    %21 = vector.broadcast %c15_i32 : i32 to vector<1x256xi32>
    %22 = arith.andi %20, %21 : vector<1x256xi32>
    %c0_i32 = arith.constant 0 : i32
    %23 = vector.broadcast %c0_i32 : i32 to vector<1x256xi32>
    %24 = arith.cmpi ne, %22, %23 : vector<1x256xi32>
    %25 = arith.extui %24 : vector<1x256xi1> to vector<1x256xi32>
    %26 = arith.sitofp %25 : vector<1x256xi32> to vector<1x256xf32>
    %c15_i32_15 = arith.constant 15 : i32
    %27 = vector.broadcast %c15_i32_15 : i32 to vector<1x256xi32>
    %28 = arith.cmpi ne, %22, %27 : vector<1x256xi32>
    %29 = arith.extui %28 : vector<1x256xi1> to vector<1x256xi32>
    %30 = arith.sitofp %29 : vector<1x256xi32> to vector<1x256xf32>
    %c16_i32 = arith.constant 16 : i32
    %31 = vector.broadcast %c16_i32 : i32 to vector<1x256xi32>
    %32 = arith.cmpi sge, %20, %31 : vector<1x256xi32>
    %33 = arith.extui %32 : vector<1x256xi1> to vector<1x256xi32>
    %34 = arith.sitofp %33 : vector<1x256xi32> to vector<1x256xf32>
    %c240_i32 = arith.constant 240 : i32
    %35 = vector.broadcast %c240_i32 : i32 to vector<1x256xi32>
    %36 = arith.cmpi slt, %20, %35 : vector<1x256xi32>
    %37 = arith.extui %36 : vector<1x256xi1> to vector<1x256xi32>
    %38 = arith.sitofp %37 : vector<1x256xi32> to vector<1x256xf32>
    %c1_i32 = arith.constant 1 : i32
    %39 = tpu.dynamic_rotate %6 by %c1_i32 dim 1 : vector<8x256xf32>, i32 -> vector<8x256xf32>
    %40 = vector.broadcast %26 : vector<1x256xf32> to vector<8x256xf32>
    %41 = arith.mulf %39, %40 : vector<8x256xf32>
    %c255_i32 = arith.constant 255 : i32
    %42 = tpu.dynamic_rotate %6 by %c255_i32 dim 1 : vector<8x256xf32>, i32 -> vector<8x256xf32>
    %43 = vector.broadcast %30 : vector<1x256xf32> to vector<8x256xf32>
    %44 = arith.mulf %42, %43 : vector<8x256xf32>
    %45 = arith.subf %44, %41 : vector<8x256xf32>
    %cst_16 = arith.constant 2.000000e+00 : f32
    %46 = vector.broadcast %cst_16 : f32 to vector<8x256xf32>
    %47 = arith.mulf %46, %6 : vector<8x256xf32>
    %48 = arith.addf %41, %47 : vector<8x256xf32>
    %49 = arith.addf %48, %44 : vector<8x256xf32>
    %c16_i32_17 = arith.constant 16 : i32
    %50 = tpu.dynamic_rotate %45 by %c16_i32_17 dim 1 : vector<8x256xf32>, i32 -> vector<8x256xf32>
    %51 = vector.broadcast %34 : vector<1x256xf32> to vector<8x256xf32>
    %52 = arith.mulf %50, %51 : vector<8x256xf32>
    %cst_18 = arith.constant 2.000000e+00 : f32
    %53 = vector.broadcast %cst_18 : f32 to vector<8x256xf32>
    %54 = arith.mulf %53, %45 : vector<8x256xf32>
    %55 = arith.addf %52, %54 : vector<8x256xf32>
    %c240_i32_19 = arith.constant 240 : i32
    %56 = tpu.dynamic_rotate %45 by %c240_i32_19 dim 1 : vector<8x256xf32>, i32 -> vector<8x256xf32>
    %57 = vector.broadcast %38 : vector<1x256xf32> to vector<8x256xf32>
    %58 = arith.mulf %56, %57 : vector<8x256xf32>
    %59 = arith.addf %55, %58 : vector<8x256xf32>
    %c240_i32_20 = arith.constant 240 : i32
    %60 = tpu.dynamic_rotate %49 by %c240_i32_20 dim 1 : vector<8x256xf32>, i32 -> vector<8x256xf32>
    %61 = vector.broadcast %38 : vector<1x256xf32> to vector<8x256xf32>
    %62 = arith.mulf %60, %61 : vector<8x256xf32>
    %c16_i32_21 = arith.constant 16 : i32
    %63 = tpu.dynamic_rotate %49 by %c16_i32_21 dim 1 : vector<8x256xf32>, i32 -> vector<8x256xf32>
    %64 = vector.broadcast %34 : vector<1x256xf32> to vector<8x256xf32>
    %65 = arith.mulf %63, %64 : vector<8x256xf32>
    %66 = arith.subf %62, %65 : vector<8x256xf32>
    %67 = arith.mulf %59, %59 : vector<8x256xf32>
    %68 = arith.mulf %66, %66 : vector<8x256xf32>
    %69 = arith.addf %67, %68 : vector<8x256xf32>
    %cst_22 = arith.constant 2.500000e-01 : f32
    %70 = vector.broadcast %cst_22 : f32 to vector<8x256xf32>
    %71 = arith.cmpf ogt, %69, %70 : vector<8x256xf32>
    %c1_i32_23 = arith.constant 1 : i32
    %72 = tpu.dynamic_rotate %1 by %c1_i32_23 dim 1 : vector<8x256xf32>, i32 -> vector<8x256xf32>
    %73 = vector.broadcast %26 : vector<1x256xf32> to vector<8x256xf32>
    %74 = arith.mulf %72, %73 : vector<8x256xf32>
    %c255_i32_24 = arith.constant 255 : i32
    %75 = tpu.dynamic_rotate %1 by %c255_i32_24 dim 1 : vector<8x256xf32>, i32 -> vector<8x256xf32>
    %76 = vector.broadcast %30 : vector<1x256xf32> to vector<8x256xf32>
    %77 = arith.mulf %75, %76 : vector<8x256xf32>
    %78 = arith.subf %77, %74 : vector<8x256xf32>
    %cst_25 = arith.constant 2.000000e+00 : f32
    %79 = vector.broadcast %cst_25 : f32 to vector<8x256xf32>
    %80 = arith.mulf %79, %1 : vector<8x256xf32>
    %81 = arith.addf %74, %80 : vector<8x256xf32>
    %82 = arith.addf %81, %77 : vector<8x256xf32>
    %c16_i32_26 = arith.constant 16 : i32
    %83 = tpu.dynamic_rotate %78 by %c16_i32_26 dim 1 : vector<8x256xf32>, i32 -> vector<8x256xf32>
    %84 = vector.broadcast %34 : vector<1x256xf32> to vector<8x256xf32>
    %85 = arith.mulf %83, %84 : vector<8x256xf32>
    %cst_27 = arith.constant 2.000000e+00 : f32
    %86 = vector.broadcast %cst_27 : f32 to vector<8x256xf32>
    %87 = arith.mulf %86, %78 : vector<8x256xf32>
    %88 = arith.addf %85, %87 : vector<8x256xf32>
    %c240_i32_28 = arith.constant 240 : i32
    %89 = tpu.dynamic_rotate %78 by %c240_i32_28 dim 1 : vector<8x256xf32>, i32 -> vector<8x256xf32>
    %90 = vector.broadcast %38 : vector<1x256xf32> to vector<8x256xf32>
    %91 = arith.mulf %89, %90 : vector<8x256xf32>
    %92 = arith.addf %88, %91 : vector<8x256xf32>
    %c240_i32_29 = arith.constant 240 : i32
    %93 = tpu.dynamic_rotate %82 by %c240_i32_29 dim 1 : vector<8x256xf32>, i32 -> vector<8x256xf32>
    %94 = vector.broadcast %38 : vector<1x256xf32> to vector<8x256xf32>
    %95 = arith.mulf %93, %94 : vector<8x256xf32>
    %c16_i32_30 = arith.constant 16 : i32
    %96 = tpu.dynamic_rotate %82 by %c16_i32_30 dim 1 : vector<8x256xf32>, i32 -> vector<8x256xf32>
    %97 = vector.broadcast %34 : vector<1x256xf32> to vector<8x256xf32>
    %98 = arith.mulf %96, %97 : vector<8x256xf32>
    %99 = arith.subf %95, %98 : vector<8x256xf32>
    %100 = arith.mulf %92, %92 : vector<8x256xf32>
    %101 = arith.mulf %99, %99 : vector<8x256xf32>
    %102 = arith.addf %100, %101 : vector<8x256xf32>
    %cst_31 = arith.constant 2.500000e-01 : f32
    %103 = vector.broadcast %cst_31 : f32 to vector<8x256xf32>
    %104 = arith.cmpf ogt, %102, %103 : vector<8x256xf32>
    %105 = arith.xori %71, %104 : vector<8x256xi1>
    %106 = arith.extui %105 : vector<8x256xi1> to vector<8x256xi32>
    %cst_32 = arith.constant dense<0> : vector<8xi32>
    %107 = vector.multi_reduction <add>, %106, %cst_32 [1] : vector<8x256xi32> to vector<8xi32>
    %108 = vector.shape_cast %107 : vector<8xi32> to vector<8x1xi32>
    %109 = vector.shape_cast %108 : vector<8x1xi32> to vector<1x8x1xi32>
    %c0_33 = arith.constant 0 : index
    %c0_34 = arith.constant 0 : index
    %c0_35 = arith.constant 0 : index
    %110 = vector.load %arg6[%c0_33, %c0_34, %c0_35] : memref<1x8x1xi32, #tpu.memory_space<vmem>>, vector<1x8x1xi32>
    tpu.vector_store %arg6[%c0_33, %c0_34, %c0_35], %109 {strides = array<i32>} : memref<1x8x1xi32, #tpu.memory_space<vmem>>, vector<1x8x1xi32>,
    return
  }
  func.func @transform_0(%arg0: i32) -> (i32, i32) {
    %c0_i32 = arith.constant 0 : i32
    %c0_i32_0 = arith.constant 0 : i32
    return %arg0, %c0_i32 : i32, i32
  }
  func.func @transform_1(%arg0: i32) -> (i32, i32) {
    %c0_i32 = arith.constant 0 : i32
    %c0_i32_0 = arith.constant 0 : i32
    return %arg0, %c0_i32 : i32, i32
  }
  func.func @transform_2(%arg0: i32) -> (i32, i32, i32) {
    %c0_i32 = arith.constant 0 : i32
    %c0_i32_0 = arith.constant 0 : i32
    %c0_i32_1 = arith.constant 0 : i32
    return %arg0, %c0_i32, %c0_i32_0 : i32, i32, i32
  }
  func.func @transform_3(%arg0: i32) -> (i32, i32, i32) {
    %c0_i32 = arith.constant 0 : i32
    %c0_i32_0 = arith.constant 0 : i32
    %c0_i32_1 = arith.constant 0 : i32
    return %arg0, %c0_i32, %c0_i32_0 : i32, i32, i32
  }
  func.func @transform_4(%arg0: i32) -> (i32, i32, i32) {
    %c0_i32 = arith.constant 0 : i32
    %c0_i32_0 = arith.constant 0 : i32
    %c0_i32_1 = arith.constant 0 : i32
    return %arg0, %c0_i32, %c0_i32_0 : i32, i32, i32
  }
  func.func @transform_5(%arg0: i32) -> (i32, i32, i32) {
    %c0_i32 = arith.constant 0 : i32
    %c0_i32_0 = arith.constant 0 : i32
    %c0_i32_1 = arith.constant 0 : i32
    return %arg0, %c0_i32, %c0_i32_0 : i32, i32, i32
  }
}

</mosaic_0001>

<bundles_post_ra>
// kernel: tpu_custom_call.1
= control target key start
LH: loop header
LB: loop body
LE: loop exit
PB: predicated region body
PF: predicated region fallthrough
CT: control target
= control target key end

     0   :  { %11 = vsyncpa [#allocation3], 0  ;;  %s542_s0 = inlined_call_operand.hbm [shape: f32[8,256], index: 0, kind: input, shape index: {}]   ;;  %s543_s1 = inlined_call_operand.hbm [shape: f32[8,256], index: 1, kind: input, shape index: {}]   ;;  %s544_s2 = inlined_call_operand.vmem [shape: f32[1,8,1], index: 2, kind: output, shape index: {0}]   ;;  %s545_s3 = inlined_call_operand.vmem [shape: f32[1,8,1], index: 3, kind: output, shape index: {1}]   ;;  %s546_s4 = inlined_call_operand.vmem [shape: f32[1,8,1], index: 4, kind: output, shape index: {2}]   ;;  %s547_s5 = inlined_call_operand.vmem [shape: s32[1,8,1], index: 5, kind: output, shape index: {3}]  }
   0x1   :  { %12 = vsyncpa [#allocation5], 0  ;;  %s355_s18 = smov [#allocation2]   ;;  %s356_s20 = smov [#allocation4]  }
   0x2   :  { %s19_s19 = sshll.u32 %s355_s18, 4  ;;  %s29_s21 = sshll.u32 %s356_s20, 4  ;;  %s20_s19 = int_to_ptr.vmem [resolvable:$true] %s19_s19  ;;  %s30_s21 = int_to_ptr.vmem [resolvable:$true] %s29_s21 }
   0x3   :  { %s307_s24 = scalar_lea.hbm %s542_s0, 256 }
   0x4   :  { %p308_p0 = scmp.ne.s32.totalorder %s542_s0, %s307_s24  ;;  %p311_p1 = scmp.lt.u32.totalorder %s307_s24, %s542_s0 }
   0x6   :  { %p313_p2 = pnand %p311_p1, %p308_p0 }
   0x8   :  { %316 = shalt.err (!%p313_p2)
}
   0x9   :  { %s317_s29 = scalar_lea.vmem %s20_s19, 256  ;;  %p322_p4 = scmp.lt.s32.totalorder %s20_s19, %s20_s19 }
   0xa   :  { %p318_p3 = scmp.ne.s32.totalorder %s20_s19, %s317_s29  ;;  %p323_p5 = scmp.lt.s32.totalorder %s317_s29, %s317_s29 }
   0xc   :  { %p324_p6 = por %p323_p5, %p322_p4 }
   0xe   :  { %p325_p7 = pnand %p324_p6, %p318_p3 }
  0x10   :  { %328 = shalt.err (!%p325_p7)
}
  0x11   :  { %22 = dma.hbm_to_vmem [thread:$0]  %s542_s0, 256, %s20_s19, [#allocation3]  }
  0x12   :  { %s329_s9 = scalar_lea.hbm %s543_s1, 256 }
  0x13   :  { %p330_p8 = scmp.ne.s32.totalorder %s543_s1, %s329_s9  ;;  %p333_p9 = scmp.lt.u32.totalorder %s329_s9, %s543_s1 }
  0x15   :  { %p335_p10 = pnand %p333_p9, %p330_p8 }
  0x17   :  { %338 = shalt.err (!%p335_p10)
}
  0x18   :  { %s339_s14 = scalar_lea.vmem %s30_s21, 256  ;;  %p344_p12 = scmp.lt.s32.totalorder %s30_s21, %s30_s21 }
  0x19   :  { %p340_p11 = scmp.ne.s32.totalorder %s30_s21, %s339_s14  ;;  %p345_p13 = scmp.lt.s32.totalorder %s339_s14, %s339_s14 }
  0x1b   :  { %p346_p0 = por %p345_p13, %p344_p12 }
  0x1d   :  { %p347_p1 = pnand %p346_p0, %p340_p11 }
  0x1f   :  { %350 = shalt.err (!%p347_p1)
}
  0x20   :  { %32 = dma.hbm_to_vmem [thread:$0]  %s543_s1, 256, %s30_s21, [#allocation5]  }
  0x21   :  { %351 = dma.done.wait [#allocation3], 256  }
  0x22   :  { %352 = vsyncadd [#allocation3], 4294967040 }
  0x23   :  { %353 = dma.done.wait [#allocation5], 256  }
  0x24   :  { %354 = vsyncadd [#allocation5], 4294967040  ;;  %v417_v0 = vld [vmem:[#allocation4 + $0x8] sm:$0xff]  ;;  %v419_v1 = vld [vmem:[#allocation4] sm:$0xff]  ;;  %s357_s16 = smov 1   ;;  %s358_s1 = smov 127   ;;  %v70_v12 = vlaneseq }
  0x25   :  { %v39_v2 = vld [vmem:[#allocation2] sm:$0xff]  ;;  %177 = vrot.lane.b32.xlu1 %v417_v0, %s357_s16  ;;  %175 = vrot.lane.b32.xlu0 %v419_v1, %s357_s16  ;;  %v40_v4 = vld [vmem:[#allocation2 + $0x8] sm:$0xff]  ;;  %v359_v23 = vmov 0.0   ;;  %v194_v40 = vmul.f32 2.0, %v417_v0  ;;  %v193_v41 = vmul.f32 2.0, %v419_v1  ;;  %s360_s17 = smov 16  }
  0x26   :  { %v283_v3 = vmul.f32 -1.442695, %v39_v2  ;;  %v284_v5 = vmul.f32 -1.442695, %v40_v4  ;;  %v433_v13 = vand.u32 127, %v70_v12  ;;  %s361_s18 = smov 112  }
  0x28   :  { %299 = vpow2.f32 %v283_v3  ;;  %v436_v16 = vadd.s32 128, %v433_v13  ;;  %v73_v17 = vand.u32 15, %v433_v13  ;;  %vm103_vm2 = vcmp.lt.s32.totalorder %v433_v13, 1 }
  0x29   :  { %301 = vpow2.f32 %v284_v5  ;;  %vm112_vm5 = vcmp.lt.s32.totalorder %v433_v13, 127  ;;  %vm87_vm6 = vcmp.ge.s32.totalorder %v433_v13, 16  ;;  %vm129_vm7 = vcmp.lt.s32.totalorder %v433_v13, 16 }
  0x2a   :  { %v74_v18 = vand.u32 15, %v436_v16  ;;  %vm75_vm0 = vcmp.ne.s32.totalorder %v73_v17, 0  ;;  %vm81_vm3 = vcmp.ne.s32.totalorder %v73_v17, 15  ;;  %vm94_vm8 = vcmp.lt.s32.totalorder %v436_v16, 240 }
  0x2b   :  { %v285_v24 = vsel %vm75_vm0, 1.0, %v359_v23  ;;  %v287_v30 = vsel %vm81_vm3, 1.0, %v359_v23  ;;  %v289_v12 = vsel %vm87_vm6, 1.0, %v359_v23  ;;  %vm142_vm9 = vcmp.lt.s32.totalorder %v433_v13, 112 }
  0x2c   :  { %vm76_vm1 = vcmp.ne.s32.totalorder %v74_v18, 0  ;;  %vm82_vm4 = vcmp.ne.s32.totalorder %v74_v18, 15  ;;  %v290_v17 = vsel %vm94_vm8, 1.0, %v359_v23  ;;  %vm60_vm0 = vcmask 7168  }
  0x2d   :  { %v286_v25 = vsel %vm76_vm1, 1.0, %v359_v23  ;;  %v288_v31 = vsel %vm82_vm4, 1.0, %v359_v23 }
  0x32   :  { %v300_v6 = vpop.eup %299 }
  0x33   :  { %v302_v7 = vpop.eup %301  ;;  %v49_v8 = vadd.f32 1.0, %v300_v6 }
  0x34   :  { %v50_v9 = vadd.f32 1.0, %v302_v7 }
  0x35   :  { %303 = vrcp.f32 %v49_v8 }
  0x36   :  { %305 = vrcp.f32 %v50_v9 }
  0x3f   :  { %v423_v10 = vpop.eup %303 }
  0x40   :  { %108 = vrot.lane.b32.xlu1 %v423_v10, %s358_s1  ;;  %99 = vrot.lane.b32.xlu0 %v423_v10, %s357_s16  ;;  %v427_v11 = vpop.eup %305  ;;  %v119_v55 = vmul.f32 2.0, %v423_v10 }
  0x41   :  { %v120_v54 = vmul.f32 2.0, %v427_v11 }
  0x44   :  { %110 = vrot.lane.b32.xlu1 %v427_v11, %s358_s1  ;;  %101 = vrot.lane.b32.xlu0 %v427_v11, %s357_s16 }
  0x48   :  { %185 = vrot.lane.b32.xlu1 %v417_v0, %s358_s1  ;;  %183 = vrot.lane.b32.xlu0 %v419_v1, %s358_s1 }
  0x97   :  { %v178_v14 = vpop.permute.xlu1 %177  ;;  %v176_v15 = vpop.permute.xlu0 %175 }
  0x98   :  { %v179_v26 = vsel %vm103_vm2, %v176_v15, %v178_v14  ;;  %v180_v27 = vsel %vm103_vm2, %v178_v14, %v176_v15 }
  0x99   :  { %v181_v34 = vmul.f32 %v285_v24, %v180_v27  ;;  %v182_v35 = vmul.f32 %v286_v25, %v179_v26 }
  0x9b   :  { %v195_v46 = vadd.f32 %v193_v41, %v181_v34  ;;  %v196_v47 = vadd.f32 %v194_v40, %v182_v35 }
  0xb2   :  { %v109_v19 = vpop.permute.xlu1 %108  ;;  %v100_v20 = vpop.permute.xlu0 %99 }
  0xb6   :  { %v111_v21 = vpop.permute.xlu1 %110  ;;  %v102_v22 = vpop.permute.xlu0 %101 }
  0xb7   :  { %v113_v42 = vsel %vm112_vm5, %v109_v19, %v111_v21  ;;  %v114_v43 = vsel %vm112_vm5, %v111_v21, %v109_v19  ;;  %v104_v44 = vsel %vm103_vm2, %v100_v20, %v102_v22  ;;  %v105_v45 = vsel %vm103_vm2, %v102_v22, %v100_v20 }
  0xb8   :  { %v115_v48 = vmul.f32 %v287_v30, %v113_v42  ;;  %v116_v49 = vmul.f32 %v288_v31, %v114_v43  ;;  %v106_v50 = vmul.f32 %v285_v24, %v105_v45  ;;  %v107_v51 = vmul.f32 %v286_v25, %v104_v44 }
  0xba   :  { %v186_v28 = vpop.permute.xlu1 %185  ;;  %v184_v29 = vpop.permute.xlu0 %183  ;;  %v118_v56 = vsub.f32 %v116_v49, %v107_v51  ;;  %v117_v57 = vsub.f32 %v115_v48, %v106_v50  ;;  %v121_v58 = vadd.f32 %v119_v55, %v106_v50  ;;  %v122_v59 = vadd.f32 %v120_v54, %v107_v51 }
  0xbb   :  { %v187_v32 = vsel %vm112_vm5, %v184_v29, %v186_v28  ;;  %v188_v33 = vsel %vm112_vm5, %v186_v28, %v184_v29 }
  0xbc   :  { %v189_v36 = vmul.f32 %v287_v30, %v187_v32  ;;  %v190_v37 = vmul.f32 %v288_v31, %v188_v33  ;;  %v124_v60 = vadd.f32 %v122_v59, %v116_v49  ;;  %v123_v61 = vadd.f32 %v121_v58, %v115_v48 }
  0xbd   :  { %v135_v28 = vmul.f32 2.0, %v118_v56  ;;  %v134_v29 = vmul.f32 2.0, %v117_v57 }
  0xbe   :  { %v454_v38 = vsub.f32 %v190_v37, %v182_v35  ;;  %v456_v39 = vsub.f32 %v189_v36, %v181_v34  ;;  %v198_v52 = vadd.f32 %v196_v47, %v190_v37  ;;  %v197_v53 = vadd.f32 %v195_v46, %v189_v36 }
  0xc0   :  { %201 = vrot.lane.b32.xlu1 %v454_v38, %s360_s17  ;;  %199 = vrot.lane.b32.xlu0 %v456_v39, %s360_s17  ;;  %v208_v25 = vmul.f32 2.0, %v454_v38  ;;  %v207_v27 = vmul.f32 2.0, %v456_v39 }
  0xc4   :  { %213 = vrot.lane.b32.xlu1 %v454_v38, %s361_s18  ;;  %211 = vrot.lane.b32.xlu0 %v456_v39, %s361_s18 }
  0xc8   :  { %223 = vrot.lane.b32.xlu1 %v198_v52, %s361_s18  ;;  %221 = vrot.lane.b32.xlu0 %v197_v53, %s361_s18 }
  0xcc   :  { %127 = vrot.lane.b32.xlu1 %v118_v56, %s360_s17  ;;  %125 = vrot.lane.b32.xlu0 %v117_v57, %s360_s17 }
  0xd0   :  { %140 = vrot.lane.b32.xlu1 %v118_v56, %s361_s18  ;;  %138 = vrot.lane.b32.xlu0 %v117_v57, %s361_s18 }
  0xd4   :  { %151 = vrot.lane.b32.xlu1 %v124_v60, %s361_s18  ;;  %149 = vrot.lane.b32.xlu0 %v123_v61, %s361_s18 }
  0xd8   :  { %159 = vrot.lane.b32.xlu1 %v124_v60, %s360_s17  ;;  %157 = vrot.lane.b32.xlu0 %v123_v61, %s360_s17 }
  0xdc   :  { %231 = vrot.lane.b32.xlu1 %v198_v52, %s360_s17  ;;  %229 = vrot.lane.b32.xlu0 %v197_v53, %s360_s17 }
 0x132   :  { %v202_v62 = vpop.permute.xlu1 %201  ;;  %v200_v63 = vpop.permute.xlu0 %199 }
 0x133   :  { %v204_v14 = vsel %vm129_vm7, %v202_v62, %v200_v63  ;;  %v203_v16 = vsel %vm129_vm7, %v200_v63, %v202_v62 }
 0x134   :  { %v205_v19 = vmul.f32 %v289_v12, %v204_v14  ;;  %v210_v31 = vadd.f32 %v208_v25, %v203_v16  ;;  %v66_v25 = vadd.f32 %v417_v0, %v419_v1 }
 0x136   :  { %v214_v2 = vpop.permute.xlu1 %213  ;;  %v212_v3 = vpop.permute.xlu0 %211  ;;  %v209_v33 = vadd.f32 %v207_v27, %v205_v19  ;;  %v55_v19 = vmul.f32 %v423_v10, %v419_v1 }
 0x137   :  { %v216_v20 = vsel %vm142_vm9, %v214_v2, %v212_v3  ;;  %v215_v43 = vsel %vm142_vm9, %v212_v3, %v214_v2 }
 0x138   :  { %v218_v32 = vmul.f32 %v290_v17, %v216_v20  ;;  %v219_v55 = vadd.f32 %v215_v43, %v209_v33  ;;  %v56_v20 = vmul.f32 %v427_v11, %v417_v0 }
 0x13a   :  { %v224_v4 = vpop.permute.xlu1 %223  ;;  %v222_v5 = vpop.permute.xlu0 %221  ;;  %v220_v47 = vadd.f32 %v218_v32, %v210_v31 }
 0x13b   :  { %v226_v38 = vsel %vm142_vm9, %v224_v4, %v222_v5  ;;  %v225_v63 = vsel %vm142_vm9, %v222_v5, %v224_v4 }
 0x13c   :  { %v228_v49 = vmul.f32 %v290_v17, %v226_v38  ;;  %v240_v62 = vmul.f32 %v220_v47, %v220_v47 }
 0x13e   :  { %v128_v6 = vpop.permute.xlu1 %127  ;;  %v126_v7 = vpop.permute.xlu0 %125 }
 0x13f   :  { %v131_v15 = vsel %vm129_vm7, %v128_v6, %v126_v7  ;;  %v130_v26 = vsel %vm129_vm7, %v126_v7, %v128_v6 }
 0x140   :  { %v132_v21 = vmul.f32 %v289_v12, %v131_v15  ;;  %v137_v34 = vadd.f32 %v135_v28, %v130_v26  ;;  %v62_v26 = vadd.f32 %v427_v11, %v423_v10 }
 0x142   :  { %v141_v8 = vpop.permute.xlu1 %140  ;;  %v139_v9 = vpop.permute.xlu0 %138  ;;  %v136_v35 = vadd.f32 %v134_v29, %v132_v21 }
 0x143   :  { %v144_v18 = vsel %vm142_vm9, %v141_v8, %v139_v9  ;;  %v143_v41 = vsel %vm142_vm9, %v139_v9, %v141_v8  ;;  %v239_v8 = vmul.f32 %v219_v55, %v219_v55 }
 0x144   :  { %v146_v30 = vmul.f32 %v290_v17, %v144_v18  ;;  %v147_v50 = vadd.f32 %v143_v41, %v136_v35 }
 0x146   :  { %v152_v22 = vpop.permute.xlu1 %151  ;;  %v150_v24 = vpop.permute.xlu0 %149  ;;  %v148_v44 = vadd.f32 %v146_v30, %v137_v34  ;;  %v167_v2 = vmul.f32 %v147_v50, %v147_v50 }
 0x147   :  { %v154_v23 = vsel %vm142_vm9, %v152_v22, %v150_v24  ;;  %v153_v48 = vsel %vm142_vm9, %v150_v24, %v152_v22  ;;  %v57_v24 = vadd.f32 %v56_v20, %v55_v19 }
 0x148   :  { %v156_v36 = vmul.f32 %v290_v17, %v154_v23  ;;  %v168_v58 = vmul.f32 %v148_v44, %v148_v44 }
 0x14a   :  { %v160_v37 = vpop.permute.xlu1 %159  ;;  %v158_v40 = vpop.permute.xlu0 %157 }
 0x14b   :  { %v161_v39 = vsel %vm129_vm7, %v158_v40, %v160_v37  ;;  %v162_v42 = vsel %vm129_vm7, %v160_v37, %v158_v40 }
 0x14c   :  { %v163_v45 = vmul.f32 %v289_v12, %v162_v42  ;;  %v166_v46 = vsub.f32 %v156_v36, %v161_v39 }
 0x14e   :  { %v165_v51 = vsub.f32 %v153_v48, %v163_v45  ;;  %v170_v52 = vmul.f32 %v166_v46, %v166_v46  ;;  %v232_v53 = vpop.permute.xlu1 %231  ;;  %v230_v54 = vpop.permute.xlu0 %229 }
 0x14f   :  { %v233_v56 = vsel %vm129_vm7, %v230_v54, %v232_v53  ;;  %v234_v57 = vsel %vm129_vm7, %v232_v53, %v230_v54 }
 0x150   :  { %v169_v59 = vmul.f32 %v165_v51, %v165_v51  ;;  %v235_v60 = vmul.f32 %v289_v12, %v234_v57  ;;  %v238_v61 = vsub.f32 %v228_v49, %v233_v56  ;;  %v172_v3 = vadd.f32 %v170_v52, %v168_v58 }
 0x151   :  { %v362_v12 = vmov 0  }
 0x152   :  { %v237_v6 = vsub.f32 %v225_v63, %v235_v60  ;;  %v242_v7 = vmul.f32 %v238_v61, %v238_v61  ;;  %v171_v9 = vadd.f32 %v169_v59, %v167_v2  ;;  %vm174_vm10 = vcmp.gt.f32.partialorder %v172_v3, 0.25 }
 0x154   :  { %v241_v14 = vmul.f32 %v237_v6, %v237_v6  ;;  %v244_v15 = vadd.f32 %v242_v7, %v240_v62  ;;  %vm173_vm13 = vcmp.gt.f32.partialorder %v171_v9, 0.25 }
 0x156   :  { %v243_v17 = vadd.f32 %v241_v14, %v239_v8  ;;  %vm246_vm11 = vcmp.gt.f32.partialorder %v244_v15, 0.25 }
 0x157   :  { %vm248_vm12 = vmxor %vm174_vm10, %vm246_vm11 }
 0x158   :  { %vm245_vm14 = vcmp.gt.f32.partialorder %v243_v17, 0.25  ;;  %v250_v16 = vsel %vm248_vm12, 1, %v362_v12 }
 0x159   :  { %vm247_vm15 = vmxor %vm173_vm13, %vm245_vm14 }
 0x15a   :  { %v249_v18 = vsel %vm247_vm15, 1, %v362_v12 }
 0x15b   :  { %v251_v13 = vadd.s32 %v250_v16, %v249_v18 }
 0x15d   :  { %v253_v4 = vshrl.u32 %v251_v13, 16  ;;  %v252_v5 = vand.u32 65535, %v251_v13 }
 0x15f   :  { %v255_v21 = vcvt.s32.f32 %v253_v4  ;;  %v254_v22 = vcvt.s32.f32 %v252_v5 }
 0x161   :  { %258 = vadd.xlane.f32.xlu0 %v255_v21  ;;  %256 = vadd.xlane.f32.xlu1 %v254_v22 }
 0x165   :  { %58 = vadd.xlane.f32.xlu0 %v57_v24  ;;  %67 = vadd.xlane.f32.xlu1 %v66_v25 }
 0x169   :  { %63 = vadd.xlane.f32.xlu0 %v62_v26 }
 0x1ee   :  { %v259_v23 = vpop.xlane.xlu0 %258  ;;  %v257_v27 = vpop.xlane.xlu1 %256 }
 0x1ef   :  { %v261_v28 = vcvt.f32.s32 %v259_v23  ;;  %v260_v30 = vcvt.f32.s32 %v257_v27 }
 0x1f1   :  { %v262_v29 = vshll.u32 %v261_v28, 16 }
 0x1f2   :  { %v59_v31 = vpop.xlane.xlu0 %58  ;;  %v68_v32 = vpop.xlane.xlu1 %67 }
 0x1f3   :  { %v263_v33 = vadd.s32 %v262_v29, %v260_v30  ;;  %61 = vst.msk [vmem:[%s544_s2] sm:$0xff] %vm60_vm0, %v59_v31  ;;  %69 = vst.msk [vmem:[%s546_s4] sm:$0xff] %vm60_vm0, %v68_v32 }
 0x1f5   :  { %264 = vst.msk [vmem:[%s547_s5] sm:$0xff] %vm60_vm0, %v263_v33 }
 0x1f6   :  { %v64_v0 = vpop.xlane.xlu0 %63 }
 0x1f7   :  { %65 = vst.msk [vmem:[%s545_s3] sm:$0xff] %vm60_vm0, %v64_v0 }
 0x1f8   :  { %281 = vsyncpa [#allocation3], 1 }
 0x1f9   :  { %282 = vsyncpa [#allocation5], 1 }

</bundles_post_ra>
